<compile_context>
chip_gen: v6e
topology: v6e:2x2x1
jax: 0.10.0
libtpu: 0.0.40
codegen_flags: <defaults>
</compile_context>

<pallas_src>
import functools
import math

import jax
import jax.numpy as jnp
from jax.experimental import pallas as pl
from jax.experimental.pallas import tpu as pltpu

LANE = 128
SUBLANE = 8
# 4096 rows x 128 lanes x 4 B = 2 MiB per f32 operand tile.
TILE_ROWS = 4096
_VMEM_LIMIT_BYTES = 32 << 20


def _dimension_semantics(num_blocks):
    """CORE_PARALLEL on v7x (2 TCs) when there is work to split, else parallel."""
    try:
        kind = jax.devices()[0].device_kind.lower()
    except Exception:  # pragma: no cover - defensive
        kind = ""
    if num_blocks >= 2 and ("v7" in kind or kind.startswith("tpu7")):
        return (pltpu.CORE_PARALLEL,)
    return ("parallel",)


def _ema_kernel(shadow_ref, param_ref, omd_ref, out_ref):
    # omd_ref: (1,) f32 in SMEM holding one_minus_decay.
    omd = omd_ref[0]
    s = shadow_ref[...]                          # f32 shadow tile
    p = param_ref[...].astype(jnp.float32)       # cast on load (bf16 ok)
    out_ref[...] = s - omd * (s - p)


def _ema_pallas(shadow2d, param2d, omd):
    """Tiled elementwise EMA update; output aliases the shadow input."""
    rows, lane = shadow2d.shape
    tile_rows = min(TILE_ROWS, rows)         # rows is always a multiple of 8
    num_blocks = pl.cdiv(rows, tile_rows)    # partial last block is fine
    nelem = rows * lane
    bytes_accessed = nelem * (4 + 4 + param2d.dtype.itemsize)
    return pl.pallas_call(
        _ema_kernel,
        out_shape=jax.ShapeDtypeStruct((rows, lane), jnp.float32),
        grid=(num_blocks,),
        in_specs=[
            pl.BlockSpec((tile_rows, lane), lambda i: (i, 0)),   # shadow
            pl.BlockSpec((tile_rows, lane), lambda i: (i, 0)),   # params
            pl.BlockSpec(memory_space=pltpu.MemorySpace.SMEM),   # one_minus_decay
        ],
        out_specs=pl.BlockSpec((tile_rows, lane), lambda i: (i, 0)),
        compiler_params=pltpu.CompilerParams(
            dimension_semantics=_dimension_semantics(num_blocks),
            vmem_limit_bytes=_VMEM_LIMIT_BYTES,
        ),
        cost_estimate=pl.CostEstimate(
            flops=3 * nelem, transcendentals=0, bytes_accessed=bytes_accessed),
        # Input 0 is the shadow slab (same shape/dtype as the output); alias it
        # so the update happens in place.  No scalar prefetch -> no index
        # ambiguity for the alias.
        input_output_aliases={0: 0},
    )(shadow2d, param2d, omd)


@functools.partial(jax.jit, static_argnames=("use_num_updates",),
                   donate_argnums=(0,))
def _ema_step(shadow2d, param2d, decay_cfg, num_updates, *, use_num_updates):
    """One EMA step on pre-flattened slabs: decay schedule + Pallas kernel."""
    if use_num_updates:
        num_updates = num_updates + 1
        nu = num_updates.astype(jnp.float32)
        decay = jnp.minimum(decay_cfg, (1.0 + nu) / (10.0 + nu))
    else:
        decay = decay_cfg
    omd = (1.0 - decay).astype(jnp.float32).reshape((1,))
    new_shadow2d = _ema_pallas(shadow2d, param2d, omd)
    return new_shadow2d, num_updates


class LitEmaJax:
    """JAX/Pallas port of LitEma.

    Shadow parameters live as ONE persistent, (8,128)-aligned flat f32 slab.
    The fast update path also consumes the model parameters as a flat slab so
    no per-step concatenation / staging pass is needed.
    """

    def __init__(self, params, decay=0.9999, use_num_updates=True):
        if decay < 0.0 or decay > 1.0:
            raise ValueError("Decay must be between 0 and 1")
        self.decay = jnp.float32(decay)
        self.use_num_updates = bool(use_num_updates)
        self.num_updates = jnp.int32(0) if use_num_updates else jnp.int32(-1)

        # Track only floating-point params (mirrors requires_grad float params).
        self._keys = [k for k, v in params.items()
                      if jnp.issubdtype(jnp.asarray(v).dtype, jnp.floating)]
        if not self._keys:
            raise ValueError("No floating-point parameters to track")
        self.m_name2s_name = {k: k.replace(".", "") for k in self._keys}
        self._param_dtype = jnp.asarray(params[self._keys[0]]).dtype

        # Static layout (shapes / sizes / offsets), computed once.
        self._shapes = {k: tuple(jnp.asarray(params[k]).shape) for k in self._keys}
        self._sizes = {k: math.prod(self._shapes[k]) for k in self._keys}
        self._offsets, off = {}, 0
        for k in self._keys:
            self._offsets[k] = off
            off += self._sizes[k]
        self._n = off
        padded = ((self._n + LANE * SUBLANE - 1) // (LANE * SUBLANE)) * (LANE * SUBLANE)
        self._rows = padded // LANE

        # Persistent f32 shadow slab, built once.
        pieces = [jnp.ravel(jnp.asarray(params[k], jnp.float32)) for k in self._keys]
        if padded > self._n:
            pieces.append(jnp.zeros((padded - self._n,), jnp.float32))
        self.shadow2d = jnp.concatenate(pieces).reshape(self._rows, LANE)

        self.collected_params = []

    # ---- flat-slab helpers -------------------------------------------------
    def flatten(self, params):
        """Pack a dict of parameter tensors into one (rows, 128) slab.

        One-time conversion (or the compat path); a fast training loop should
        keep its params as this slab and call update_from_flat() directly.
        """
        pieces = [jnp.ravel(jnp.asarray(params[k])).astype(self._param_dtype)
                  for k in self._keys]
        pad = self._rows * LANE - self._n
        if pad:
            pieces.append(jnp.zeros((pad,), self._param_dtype))
        return jnp.concatenate(pieces).reshape(self._rows, LANE)

    def unflatten(self, slab):
        flat = slab.reshape(-1)
        return {k: flat[self._offsets[k]:self._offsets[k] + self._sizes[k]]
                .reshape(self._shapes[k]) for k in self._keys}

    # ---- EMA update (forward) ----------------------------------------------
    def update_from_flat(self, param2d):
        """Fast path: params already live as a flat (rows, 128) slab."""
        self.shadow2d, self.num_updates = _ema_step(
            self.shadow2d, param2d, self.decay, self.num_updates,
            use_num_updates=self.use_num_updates)

    def __call__(self, params):
        # Compatibility path (dict of tensors, like LitEma.forward(model)).
        # For best performance keep training params flat and use
        # update_from_flat() instead.
        self.update_from_flat(self.flatten(params))

    # ---- misc (copy_to / store / restore) ----------------------------------
    def copy_to(self):
        """Return dict model-param-name -> EMA value (per-tensor views)."""
        return self.unflatten(self.shadow2d)

    def store(self, params):
        self.collected_params = [jnp.asarray(p) for p in params]

    def restore(self):
        return list(self.collected_params)


if __name__ == "__main__":
    key = jax.random.PRNGKey(0)
    k1, k2, k3, k4, k5 = jax.random.split(key, 5)

    # Deterministic synthetic "model" parameters (tiny conv + linear net).
    params = {
        "conv.weight": jax.random.normal(k1, (4, 4, 3, 3), jnp.float32),
        "conv.bias": jax.random.normal(k2, (4,), jnp.float32),
        "fc.weight": jax.random.normal(k3, (32, 16), jnp.float32),
        "fc.bias": jax.random.normal(k4, (32,), jnp.float32),
    }

    ema = LitEmaJax(params, decay=0.9999, use_num_updates=True)

    # One simulated training step changes the params.
    new_params = {
        k: v + 0.1 * jax.random.normal(jax.random.fold_in(k5, i), v.shape, v.dtype)
        for i, (k, v) in enumerate(params.items())
    }
    # The training side keeps its params as a flat slab (built once here), so
    # the per-step EMA update needs no concatenation / staging pass.
    new_param_slab = ema.flatten(new_params)

    ema.update_from_flat(new_param_slab)
    jax.block_until_ready(ema.shadow2d)

    # Reference check (num_updates went 0 -> 1).
    decay = min(0.9999, (1.0 + 1.0) / (10.0 + 1.0))
    omd = jnp.float32(1.0 - decay)
    ema_vals = ema.copy_to()
    ok = True
    for k in params:
        ref = params[k] - omd * (params[k] - new_params[k])
        if not jnp.allclose(ema_vals[k], ref, atol=1e-5, rtol=1e-5):
            ok = False

    print("KERNEL_OK" if ok else "KERNEL_MISMATCH")
</pallas_src>

<mosaic_0001>
module attributes {stable_mosaic.version = 11 : i64} {
  func.func @_ema_kernel(%arg0: i32, %arg1: memref<8x128xf32, #tpu.memory_space<vmem>>, %arg2: memref<8x128xf32, #tpu.memory_space<vmem>>, %arg3: memref<1xf32, #tpu.memory_space<smem>>, %arg4: memref<8x128xf32, #tpu.memory_space<vmem>>) attributes {dimension_semantics = [#tpu.dimension_semantics<parallel>], iteration_bounds = array<i64: 1>, scalar_prefetch = 0 : i64, scratch_operands = 0 : i64, tpu.core_type = #tpu.core_type<tc>, window_params = [{transform_indices = @transform_0, window_bounds = array<i64: 8, 128>}, {transform_indices = @transform_1, window_bounds = array<i64: 8, 128>}, {transform_indices = @transform_2, window_bounds = array<i64: 1>}, {transform_indices = @transform_3, window_bounds = array<i64: 8, 128>}]} {
    %c0 = arith.constant 0 : index
    %0 = memref.load %arg3[%c0] : memref<1xf32, #tpu.memory_space<smem>>
    %c0_0 = arith.constant 0 : index
    %c0_1 = arith.constant 0 : index
    %1 = vector.load %arg1[%c0_0, %c0_1] : memref<8x128xf32, #tpu.memory_space<vmem>>, vector<8x128xf32>
    %c0_2 = arith.constant 0 : index
    %c0_3 = arith.constant 0 : index
    %2 = vector.load %arg2[%c0_2, %c0_3] : memref<8x128xf32, #tpu.memory_space<vmem>>, vector<8x128xf32>
    %3 = arith.subf %1, %2 : vector<8x128xf32>
    %4 = vector.broadcast %0 : f32 to vector<8x128xf32>
    %5 = arith.mulf %4, %3 : vector<8x128xf32>
    %6 = arith.subf %1, %5 : vector<8x128xf32>
    %c0_4 = arith.constant 0 : index
    %c0_5 = arith.constant 0 : index
    %7 = vector.load %arg4[%c0_4, %c0_5] : memref<8x128xf32, #tpu.memory_space<vmem>>, vector<8x128xf32>
    tpu.vector_store %arg4[%c0_4, %c0_5], %6 {strides = array<i32>} : memref<8x128xf32, #tpu.memory_space<vmem>>, vector<8x128xf32>,
    return
  }
  func.func @transform_0(%arg0: i32) -> (i32, i32) {
    %c0_i32 = arith.constant 0 : i32
    %c0_i32_0 = arith.constant 0 : i32
    return %arg0, %c0_i32 : i32, i32
  }
  func.func @transform_1(%arg0: i32) -> (i32, i32) {
    %c0_i32 = arith.constant 0 : i32
    %c0_i32_0 = arith.constant 0 : i32
    return %arg0, %c0_i32 : i32, i32
  }
  func.func @transform_2(%arg0: i32) -> i32 {
    %c0_i32 = arith.constant 0 : i32
    %c0_i32_0 = arith.constant 0 : i32
    return %c0_i32 : i32
  }
  func.func @transform_3(%arg0: i32) -> (i32, i32) {
    %c0_i32 = arith.constant 0 : i32
    %c0_i32_0 = arith.constant 0 : i32
    return %arg0, %c0_i32 : i32, i32
  }
}

</mosaic_0001>

<bundles_post_ra>
// kernel: _ema_step.1
= control target key start
LH: loop header
LB: loop body
LE: loop exit
PB: predicated region body
PF: predicated region fallthrough
CT: control target
= control target key end

     0   :  { %s59_s0 = inlined_call_operand.vmem [shape: f32[8,128], index: 0, kind: input, shape index: {}, may-alias: {0,3}]   ;;  %s60_s1 = inlined_call_operand.vmem [shape: f32[8,128], index: 1, kind: input, shape index: {}]   ;;  %s61_s2 = inlined_call_operand.<no memory space> [shape: f32[1], index: 2, kind: input, shape index: {}]   ;;  %s62_s3 = inlined_call_operand.vmem [shape: f32[8,128], index: 3, kind: output, shape index: {}, may-alias: {0,3}]  }
   0x1   :  { %v16_v0 = vld [vmem:[%s59_s0] sm:$0xff]  ;;  %v19_v2 = vstv %s61_s2 }
   0x2   :  { %v17_v1 = vld [vmem:[%s60_s1] sm:$0xff] }
   0x3   :  { %v18_v3 = vsub.f32 %v16_v0, %v17_v1 }
   0x5   :  { %v20_v4 = vmul.f32 %v19_v2, %v18_v3 }
   0x7   :  { %v21_v5 = vsub.f32 %v16_v0, %v20_v4 }
   0x9   :  { %22 = vst [vmem:[%s62_s3] sm:$0xff] %v21_v5 }

</bundles_post_ra>
